<compile_context>
chip_gen: v7x
topology: tpu7x:2x2x1
jax: 0.10.0
libtpu: 0.0.40
codegen_flags: <defaults>
</compile_context>

<pallas_src>
import functools

import jax
import jax.numpy as jnp
from jax.experimental import pallas as pl
from jax.experimental.pallas import tpu as pltpu

SUBLANES = 8  # pad batch so the M dim of every matmul fills the sublanes


def _make_kernel(num_layers, T, Bp, H):
    def kernel(*refs):
        x_ref = refs[0]                                   # (T*Bp, I) time-major
        pos = 1
        layers = []
        for _ in range(num_layers):
            layers.append(refs[pos:pos + 3])              # wih (in,H), whh (H,H), bias (1,H)
            pos += 3
        w1_ref, b1_ref, w2_ref, b2_ref, w3_ref, b3_ref = refs[pos:pos + 6]
        pos += 6
        out_ref = refs[pos]
        seq_tm_ref = refs[pos + 1]                        # (T*Bp, H) scratch
        seq_bt_ref = refs[pos + 2]                        # (Bp, T*H) scratch

        def run_layer(inp, wih_ref, whh_ref, bias_ref, is_last):
            # Hoisted input projection + folded bias: one big matmul outside
            # the serial recurrence.
            xp = (jnp.dot(inp, wih_ref[...],
                          preferred_element_type=jnp.float32)
                  + bias_ref[...])                        # (T*Bp, H)
            whh = whh_ref[...]
            h = jnp.zeros((Bp, H), jnp.float32)
            # Fully unrolled recurrence (T static & small): per step only
            # one (Bp,H)@(H,H) matmul + add + tanh on the critical path.
            for t in range(T):
                pre = xp[t * Bp:(t + 1) * Bp, :] + jnp.dot(
                    h, whh, preferred_element_type=jnp.float32)
                h = jnp.tanh(pre)
                if is_last:
                    # lane-dense flatten layout for the single fc1 matmul
                    seq_bt_ref[:, t * H:(t + 1) * H] = h
                else:
                    # time-major layout: next layer's projection is 1 matmul
                    seq_tm_ref[t * Bp:(t + 1) * Bp, :] = h

        run_layer(x_ref[...], *layers[0], is_last=(num_layers == 1))
        for l in range(1, num_layers):
            run_layer(seq_tm_ref[...], *layers[l],
                      is_last=(l == num_layers - 1))

        # MLP head. fc1 is a single (Bp, T*H) @ (T*H, 128) MXU op.
        y = jnp.dot(seq_bt_ref[...], w1_ref[...],
                    preferred_element_type=jnp.float32) + b1_ref[...]
        y = jnp.maximum(y, 0.0)                                          # relu
        y = jnp.dot(y, w2_ref[...],
                    preferred_element_type=jnp.float32) + b2_ref[...]
        y = jnp.maximum(y, 0.0)                                          # relu
        y = jnp.dot(y, w3_ref[...],
                    preferred_element_type=jnp.float32) + b3_ref[...]
        # sigmoid(y) == 0.5 * (tanh(y/2) + 1): exact, EUP-only (no divide).
        out_ref[...] = 0.5 * (jnp.tanh(0.5 * y) + 1.0)

    return kernel


def _full_spec(shape):
    nd = len(shape)
    return pl.BlockSpec(shape, lambda i, _nd=nd: (0,) * _nd)


def rnn_forward(x, params, *, num_layers, hidden_size):
    """x: (B, T, I) float32 (PyTorch batch_first layout). Returns (B, 1)."""
    B, T, I = x.shape
    H = hidden_size
    Bp = ((B + SUBLANES - 1) // SUBLANES) * SUBLANES      # pad batch to 8k

    x = jnp.asarray(x, jnp.float32)
    if Bp != B:
        x = jnp.pad(x, ((0, Bp - B), (0, 0), (0, 0)))
    # batch_first (Bp, T, I) -> time-major stacked (T*Bp, I)
    x_flat = jnp.transpose(x, (1, 0, 2)).reshape(T * Bp, I)

    inputs = [x_flat]
    for l in range(num_layers):
        wih, whh, bih, bhh = params["rnn"][l]
        inputs += [jnp.asarray(wih).T,                                  # (in_dim, H)
                   jnp.asarray(whh).T,                                  # (H, H)
                   (jnp.asarray(bih) + jnp.asarray(bhh)).reshape(1, H)]  # folded bias

    w1, b1 = params["fc1"]
    w2, b2 = params["fc2"]
    w3, b3 = params["fc3"]
    inputs += [jnp.asarray(w1).T,                         # (T*H, 128) - plain W1.T
               jnp.asarray(b1).reshape(1, 128),
               jnp.asarray(w2).T, jnp.asarray(b2).reshape(1, 64),
               jnp.asarray(w3).T, jnp.asarray(b3).reshape(1, 1)]

    in_specs = [_full_spec(a.shape) for a in inputs]

    out = pl.pallas_call(
        _make_kernel(num_layers, T, Bp, H),
        out_shape=jax.ShapeDtypeStruct((Bp, 1), jnp.float32),
        grid=(1,),
        in_specs=in_specs,
        out_specs=pl.BlockSpec((Bp, 1), lambda i: (0, 0)),
        scratch_shapes=[pltpu.VMEM((T * Bp, H), jnp.float32),   # time-major
                        pltpu.VMEM((Bp, T * H), jnp.float32)],  # fc1 flatten
        compiler_params=pltpu.CompilerParams(
            dimension_semantics=("arbitrary",)),
    )(*inputs)
    return out[:B]


def init_params(key, input_size, hidden_size, sequence_length, num_layers):
    """Deterministic init matching the PyTorch module's parameter shapes."""
    H = hidden_size
    params = {"rnn": []}
    k = key

    def uni(k, shape, bound):
        return jax.random.uniform(k, shape, jnp.float32, -bound, bound)

    bound_rnn = 1.0 / jnp.sqrt(H)
    for l in range(num_layers):
        in_dim = input_size if l == 0 else H
        k, k1, k2, k3, k4 = jax.random.split(k, 5)
        params["rnn"].append((uni(k1, (H, in_dim), bound_rnn),
                              uni(k2, (H, H), bound_rnn),
                              uni(k3, (H,), bound_rnn),
                              uni(k4, (H,), bound_rnn)))

    def linear(k, out_f, in_f):
        k1, k2 = jax.random.split(k)
        b = 1.0 / jnp.sqrt(in_f)
        return (uni(k1, (out_f, in_f), b), uni(k2, (out_f,), b))

    k, k1, k2, k3 = jax.random.split(k, 4)
    params["fc1"] = linear(k1, 128, H * sequence_length)
    params["fc2"] = linear(k2, 64, 128)
    params["fc3"] = linear(k3, 1, 64)
    return params


def ref_forward(x, params, *, num_layers, hidden_size):
    """Pure-JAX reference mirroring torch semantics (eval mode)."""
    B, T, _ = x.shape
    H = hidden_size
    inp = x
    for l in range(num_layers):
        wih, whh, bih, bhh = params["rnn"][l]
        h = jnp.zeros((B, H), jnp.float32)
        outs = []
        for t in range(T):
            h = jnp.tanh(inp[:, t, :] @ wih.T + bih + h @ whh.T + bhh)
            outs.append(h)
        inp = jnp.stack(outs, axis=1)
    flat = inp.reshape(B, -1)
    w1, b1 = params["fc1"]
    w2, b2 = params["fc2"]
    w3, b3 = params["fc3"]
    y = jnp.maximum(flat @ w1.T + b1, 0.0)
    y = jnp.maximum(y @ w2.T + b2, 0.0)
    y = y @ w3.T + b3
    return jax.nn.sigmoid(y)


if __name__ == "__main__":
    batch = 2
    input_size = 4
    hidden_size = 32
    sequence_length = 8
    num_layers = 2

    key = jax.random.PRNGKey(0)
    kx, kp = jax.random.split(key)
    x = jax.random.normal(kx, (batch, sequence_length, input_size), jnp.float32)
    params = init_params(kp, input_size, hidden_size, sequence_length, num_layers)

    fwd = functools.partial(rnn_forward, num_layers=num_layers,
                            hidden_size=hidden_size)
    out = jax.block_until_ready(fwd(x, params))

    ref = ref_forward(x, params, num_layers=num_layers, hidden_size=hidden_size)
    assert out.shape == (batch, 1), out.shape
    assert jnp.allclose(out, ref, atol=1e-4, rtol=1e-4), (out, ref)

    print("KERNEL_OK")
</pallas_src>

<mosaic_0001>
module attributes {stable_mosaic.version = 11 : i64} {
  func.func @kernel(%arg0: i32, %arg1: memref<64x4xf32, #tpu.memory_space<vmem>>, %arg2: memref<4x32xf32, #tpu.memory_space<vmem>>, %arg3: memref<32x32xf32, #tpu.memory_space<vmem>>, %arg4: memref<1x32xf32, #tpu.memory_space<vmem>>, %arg5: memref<32x32xf32, #tpu.memory_space<vmem>>, %arg6: memref<32x32xf32, #tpu.memory_space<vmem>>, %arg7: memref<1x32xf32, #tpu.memory_space<vmem>>, %arg8: memref<256x128xf32, #tpu.memory_space<vmem>>, %arg9: memref<1x128xf32, #tpu.memory_space<vmem>>, %arg10: memref<128x64xf32, #tpu.memory_space<vmem>>, %arg11: memref<1x64xf32, #tpu.memory_space<vmem>>, %arg12: memref<64x1xf32, #tpu.memory_space<vmem>>, %arg13: memref<1x1xf32, #tpu.memory_space<vmem>>, %arg14: memref<8x1xf32, #tpu.memory_space<vmem>>, %arg15: memref<64x32xf32, #tpu.memory_space<vmem>>, %arg16: memref<8x256xf32, #tpu.memory_space<vmem>>) attributes {dimension_semantics = [#tpu.dimension_semantics<arbitrary>], iteration_bounds = array<i64: 1>, scalar_prefetch = 0 : i64, scratch_operands = 2 : i64, tpu.core_type = #tpu.core_type<tc>, window_params = [{pipeline_mode = #tpu.pipeline_mode<synchronous>, transform_indices = @transform_0, window_bounds = array<i64: 64, 4>}, {pipeline_mode = #tpu.pipeline_mode<synchronous>, transform_indices = @transform_1, window_bounds = array<i64: 4, 32>}, {pipeline_mode = #tpu.pipeline_mode<synchronous>, transform_indices = @transform_2, window_bounds = array<i64: 32, 32>}, {pipeline_mode = #tpu.pipeline_mode<synchronous>, transform_indices = @transform_3, window_bounds = array<i64: 1, 32>}, {pipeline_mode = #tpu.pipeline_mode<synchronous>, transform_indices = @transform_4, window_bounds = array<i64: 32, 32>}, {pipeline_mode = #tpu.pipeline_mode<synchronous>, transform_indices = @transform_5, window_bounds = array<i64: 32, 32>}, {pipeline_mode = #tpu.pipeline_mode<synchronous>, transform_indices = @transform_6, window_bounds = array<i64: 1, 32>}, {pipeline_mode = #tpu.pipeline_mode<synchronous>, transform_indices = @transform_7, window_bounds = array<i64: 256, 128>}, {pipeline_mode = #tpu.pipeline_mode<synchronous>, transform_indices = @transform_8, window_bounds = array<i64: 1, 128>}, {pipeline_mode = #tpu.pipeline_mode<synchronous>, transform_indices = @transform_9, window_bounds = array<i64: 128, 64>}, {pipeline_mode = #tpu.pipeline_mode<synchronous>, transform_indices = @transform_10, window_bounds = array<i64: 1, 64>}, {pipeline_mode = #tpu.pipeline_mode<synchronous>, transform_indices = @transform_11, window_bounds = array<i64: 64, 1>}, {pipeline_mode = #tpu.pipeline_mode<synchronous>, transform_indices = @transform_12, window_bounds = array<i64: 1, 1>}, {pipeline_mode = #tpu.pipeline_mode<synchronous>, transform_indices = @transform_13, window_bounds = array<i64: 8, 1>}]} {
    %c0 = arith.constant 0 : index
    %c0_0 = arith.constant 0 : index
    %0 = vector.load %arg1[%c0, %c0_0] : memref<64x4xf32, #tpu.memory_space<vmem>>, vector<64x4xf32>
    %c0_1 = arith.constant 0 : index
    %c0_2 = arith.constant 0 : index
    %1 = vector.load %arg2[%c0_1, %c0_2] : memref<4x32xf32, #tpu.memory_space<vmem>>, vector<4x32xf32>
    %cst = arith.constant dense<0.000000e+00> : vector<64x32xf32>
    %2 = tpu.matmul %0, %1, %cst {dimension_numbers = #tpu.dot_dimension_numbers<[1], [0], [0], [1], [0, 0, 1, 1], [], []>} : vector<64x4xf32>, vector<4x32xf32>, vector<64x32xf32> -> vector<64x32xf32>
    %c0_3 = arith.constant 0 : index
    %c0_4 = arith.constant 0 : index
    %3 = vector.load %arg4[%c0_3, %c0_4] : memref<1x32xf32, #tpu.memory_space<vmem>>, vector<1x32xf32>
    %4 = vector.broadcast %3 : vector<1x32xf32> to vector<64x32xf32>
    %5 = arith.addf %2, %4 : vector<64x32xf32>
    %c0_5 = arith.constant 0 : index
    %c0_6 = arith.constant 0 : index
    %6 = vector.load %arg3[%c0_5, %c0_6] : memref<32x32xf32, #tpu.memory_space<vmem>>, vector<32x32xf32>
    %cst_7 = arith.constant 0.000000e+00 : f32
    %7 = vector.broadcast %cst_7 : f32 to vector<8x32xf32>
    %8 = vector.extract_strided_slice %5 {offsets = [0, 0], sizes = [8, 32], strides = [1, 1]} : vector<64x32xf32> to vector<8x32xf32>
    %cst_8 = arith.constant dense<0.000000e+00> : vector<8x32xf32>
    %9 = tpu.matmul %7, %6, %cst_8 {dimension_numbers = #tpu.dot_dimension_numbers<[1], [0], [0], [1], [0, 0, 1, 1], [], []>} : vector<8x32xf32>, vector<32x32xf32>, vector<8x32xf32> -> vector<8x32xf32>
    %10 = arith.addf %8, %9 : vector<8x32xf32>
    %11 = math.tanh %10 : vector<8x32xf32>
    %c0_9 = arith.constant 0 : index
    %c0_10 = arith.constant 0 : index
    %12 = vector.load %arg15[%c0_9, %c0_10] : memref<64x32xf32, #tpu.memory_space<vmem>>, vector<8x32xf32>
    tpu.vector_store %arg15[%c0_9, %c0_10], %11 {strides = array<i32>} : memref<64x32xf32, #tpu.memory_space<vmem>>, vector<8x32xf32>,
    %13 = vector.extract_strided_slice %5 {offsets = [8, 0], sizes = [8, 32], strides = [1, 1]} : vector<64x32xf32> to vector<8x32xf32>
    %cst_11 = arith.constant dense<0.000000e+00> : vector<8x32xf32>
    %14 = tpu.matmul %11, %6, %cst_11 {dimension_numbers = #tpu.dot_dimension_numbers<[1], [0], [0], [1], [0, 0, 1, 1], [], []>} : vector<8x32xf32>, vector<32x32xf32>, vector<8x32xf32> -> vector<8x32xf32>
    %15 = arith.addf %13, %14 : vector<8x32xf32>
    %16 = math.tanh %15 : vector<8x32xf32>
    %c8 = arith.constant 8 : index
    %c0_12 = arith.constant 0 : index
    %17 = vector.load %arg15[%c8, %c0_12] : memref<64x32xf32, #tpu.memory_space<vmem>>, vector<8x32xf32>
    tpu.vector_store %arg15[%c8, %c0_12], %16 {strides = array<i32>} : memref<64x32xf32, #tpu.memory_space<vmem>>, vector<8x32xf32>,
    %18 = vector.extract_strided_slice %5 {offsets = [16, 0], sizes = [8, 32], strides = [1, 1]} : vector<64x32xf32> to vector<8x32xf32>
    %cst_13 = arith.constant dense<0.000000e+00> : vector<8x32xf32>
    %19 = tpu.matmul %16, %6, %cst_13 {dimension_numbers = #tpu.dot_dimension_numbers<[1], [0], [0], [1], [0, 0, 1, 1], [], []>} : vector<8x32xf32>, vector<32x32xf32>, vector<8x32xf32> -> vector<8x32xf32>
    %20 = arith.addf %18, %19 : vector<8x32xf32>
    %21 = math.tanh %20 : vector<8x32xf32>
    %c16 = arith.constant 16 : index
    %c0_14 = arith.constant 0 : index
    %22 = vector.load %arg15[%c16, %c0_14] : memref<64x32xf32, #tpu.memory_space<vmem>>, vector<8x32xf32>
    tpu.vector_store %arg15[%c16, %c0_14], %21 {strides = array<i32>} : memref<64x32xf32, #tpu.memory_space<vmem>>, vector<8x32xf32>,
    %23 = vector.extract_strided_slice %5 {offsets = [24, 0], sizes = [8, 32], strides = [1, 1]} : vector<64x32xf32> to vector<8x32xf32>
    %cst_15 = arith.constant dense<0.000000e+00> : vector<8x32xf32>
    %24 = tpu.matmul %21, %6, %cst_15 {dimension_numbers = #tpu.dot_dimension_numbers<[1], [0], [0], [1], [0, 0, 1, 1], [], []>} : vector<8x32xf32>, vector<32x32xf32>, vector<8x32xf32> -> vector<8x32xf32>
    %25 = arith.addf %23, %24 : vector<8x32xf32>
    %26 = math.tanh %25 : vector<8x32xf32>
    %c24 = arith.constant 24 : index
    %c0_16 = arith.constant 0 : index
    %27 = vector.load %arg15[%c24, %c0_16] : memref<64x32xf32, #tpu.memory_space<vmem>>, vector<8x32xf32>
    tpu.vector_store %arg15[%c24, %c0_16], %26 {strides = array<i32>} : memref<64x32xf32, #tpu.memory_space<vmem>>, vector<8x32xf32>,
    %28 = vector.extract_strided_slice %5 {offsets = [32, 0], sizes = [8, 32], strides = [1, 1]} : vector<64x32xf32> to vector<8x32xf32>
    %cst_17 = arith.constant dense<0.000000e+00> : vector<8x32xf32>
    %29 = tpu.matmul %26, %6, %cst_17 {dimension_numbers = #tpu.dot_dimension_numbers<[1], [0], [0], [1], [0, 0, 1, 1], [], []>} : vector<8x32xf32>, vector<32x32xf32>, vector<8x32xf32> -> vector<8x32xf32>
    %30 = arith.addf %28, %29 : vector<8x32xf32>
    %31 = math.tanh %30 : vector<8x32xf32>
    %c32 = arith.constant 32 : index
    %c0_18 = arith.constant 0 : index
    %32 = vector.load %arg15[%c32, %c0_18] : memref<64x32xf32, #tpu.memory_space<vmem>>, vector<8x32xf32>
    tpu.vector_store %arg15[%c32, %c0_18], %31 {strides = array<i32>} : memref<64x32xf32, #tpu.memory_space<vmem>>, vector<8x32xf32>,
    %33 = vector.extract_strided_slice %5 {offsets = [40, 0], sizes = [8, 32], strides = [1, 1]} : vector<64x32xf32> to vector<8x32xf32>
    %cst_19 = arith.constant dense<0.000000e+00> : vector<8x32xf32>
    %34 = tpu.matmul %31, %6, %cst_19 {dimension_numbers = #tpu.dot_dimension_numbers<[1], [0], [0], [1], [0, 0, 1, 1], [], []>} : vector<8x32xf32>, vector<32x32xf32>, vector<8x32xf32> -> vector<8x32xf32>
    %35 = arith.addf %33, %34 : vector<8x32xf32>
    %36 = math.tanh %35 : vector<8x32xf32>
    %c40 = arith.constant 40 : index
    %c0_20 = arith.constant 0 : index
    %37 = vector.load %arg15[%c40, %c0_20] : memref<64x32xf32, #tpu.memory_space<vmem>>, vector<8x32xf32>
    tpu.vector_store %arg15[%c40, %c0_20], %36 {strides = array<i32>} : memref<64x32xf32, #tpu.memory_space<vmem>>, vector<8x32xf32>,
    %38 = vector.extract_strided_slice %5 {offsets = [48, 0], sizes = [8, 32], strides = [1, 1]} : vector<64x32xf32> to vector<8x32xf32>
    %cst_21 = arith.constant dense<0.000000e+00> : vector<8x32xf32>
    %39 = tpu.matmul %36, %6, %cst_21 {dimension_numbers = #tpu.dot_dimension_numbers<[1], [0], [0], [1], [0, 0, 1, 1], [], []>} : vector<8x32xf32>, vector<32x32xf32>, vector<8x32xf32> -> vector<8x32xf32>
    %40 = arith.addf %38, %39 : vector<8x32xf32>
    %41 = math.tanh %40 : vector<8x32xf32>
    %c48 = arith.constant 48 : index
    %c0_22 = arith.constant 0 : index
    %42 = vector.load %arg15[%c48, %c0_22] : memref<64x32xf32, #tpu.memory_space<vmem>>, vector<8x32xf32>
    tpu.vector_store %arg15[%c48, %c0_22], %41 {strides = array<i32>} : memref<64x32xf32, #tpu.memory_space<vmem>>, vector<8x32xf32>,
    %43 = vector.extract_strided_slice %5 {offsets = [56, 0], sizes = [8, 32], strides = [1, 1]} : vector<64x32xf32> to vector<8x32xf32>
    %cst_23 = arith.constant dense<0.000000e+00> : vector<8x32xf32>
    %44 = tpu.matmul %41, %6, %cst_23 {dimension_numbers = #tpu.dot_dimension_numbers<[1], [0], [0], [1], [0, 0, 1, 1], [], []>} : vector<8x32xf32>, vector<32x32xf32>, vector<8x32xf32> -> vector<8x32xf32>
    %45 = arith.addf %43, %44 : vector<8x32xf32>
    %46 = math.tanh %45 : vector<8x32xf32>
    %c56 = arith.constant 56 : index
    %c0_24 = arith.constant 0 : index
    %47 = vector.load %arg15[%c56, %c0_24] : memref<64x32xf32, #tpu.memory_space<vmem>>, vector<8x32xf32>
    tpu.vector_store %arg15[%c56, %c0_24], %46 {strides = array<i32>} : memref<64x32xf32, #tpu.memory_space<vmem>>, vector<8x32xf32>,
    %c0_25 = arith.constant 0 : index
    %c0_26 = arith.constant 0 : index
    %48 = vector.load %arg15[%c0_25, %c0_26] : memref<64x32xf32, #tpu.memory_space<vmem>>, vector<64x32xf32>
    %c0_27 = arith.constant 0 : index
    %c0_28 = arith.constant 0 : index
    %49 = vector.load %arg5[%c0_27, %c0_28] : memref<32x32xf32, #tpu.memory_space<vmem>>, vector<32x32xf32>
    %cst_29 = arith.constant dense<0.000000e+00> : vector<64x32xf32>
    %50 = tpu.matmul %48, %49, %cst_29 {dimension_numbers = #tpu.dot_dimension_numbers<[1], [0], [0], [1], [0, 0, 1, 1], [], []>} : vector<64x32xf32>, vector<32x32xf32>, vector<64x32xf32> -> vector<64x32xf32>
    %c0_30 = arith.constant 0 : index
    %c0_31 = arith.constant 0 : index
    %51 = vector.load %arg7[%c0_30, %c0_31] : memref<1x32xf32, #tpu.memory_space<vmem>>, vector<1x32xf32>
    %52 = vector.broadcast %51 : vector<1x32xf32> to vector<64x32xf32>
    %53 = arith.addf %50, %52 : vector<64x32xf32>
    %c0_32 = arith.constant 0 : index
    %c0_33 = arith.constant 0 : index
    %54 = vector.load %arg6[%c0_32, %c0_33] : memref<32x32xf32, #tpu.memory_space<vmem>>, vector<32x32xf32>
    %cst_34 = arith.constant 0.000000e+00 : f32
    %55 = vector.broadcast %cst_34 : f32 to vector<8x32xf32>
    %56 = vector.extract_strided_slice %53 {offsets = [0, 0], sizes = [8, 32], strides = [1, 1]} : vector<64x32xf32> to vector<8x32xf32>
    %cst_35 = arith.constant dense<0.000000e+00> : vector<8x32xf32>
    %57 = tpu.matmul %55, %54, %cst_35 {dimension_numbers = #tpu.dot_dimension_numbers<[1], [0], [0], [1], [0, 0, 1, 1], [], []>} : vector<8x32xf32>, vector<32x32xf32>, vector<8x32xf32> -> vector<8x32xf32>
    %58 = arith.addf %56, %57 : vector<8x32xf32>
    %59 = math.tanh %58 : vector<8x32xf32>
    %c0_36 = arith.constant 0 : index
    %c0_37 = arith.constant 0 : index
    %60 = vector.load %arg16[%c0_36, %c0_37] : memref<8x256xf32, #tpu.memory_space<vmem>>, vector<8x32xf32>
    tpu.vector_store %arg16[%c0_36, %c0_37], %59 {strides = array<i32>} : memref<8x256xf32, #tpu.memory_space<vmem>>, vector<8x32xf32>,
    %61 = vector.extract_strided_slice %53 {offsets = [8, 0], sizes = [8, 32], strides = [1, 1]} : vector<64x32xf32> to vector<8x32xf32>
    %cst_38 = arith.constant dense<0.000000e+00> : vector<8x32xf32>
    %62 = tpu.matmul %59, %54, %cst_38 {dimension_numbers = #tpu.dot_dimension_numbers<[1], [0], [0], [1], [0, 0, 1, 1], [], []>} : vector<8x32xf32>, vector<32x32xf32>, vector<8x32xf32> -> vector<8x32xf32>
    %63 = arith.addf %61, %62 : vector<8x32xf32>
    %64 = math.tanh %63 : vector<8x32xf32>
    %c0_39 = arith.constant 0 : index
    %c32_40 = arith.constant 32 : index
    %65 = vector.load %arg16[%c0_39, %c32_40] : memref<8x256xf32, #tpu.memory_space<vmem>>, vector<8x32xf32>
    tpu.vector_store %arg16[%c0_39, %c32_40], %64 {strides = array<i32>} : memref<8x256xf32, #tpu.memory_space<vmem>>, vector<8x32xf32>,
    %66 = vector.extract_strided_slice %53 {offsets = [16, 0], sizes = [8, 32], strides = [1, 1]} : vector<64x32xf32> to vector<8x32xf32>
    %cst_41 = arith.constant dense<0.000000e+00> : vector<8x32xf32>
    %67 = tpu.matmul %64, %54, %cst_41 {dimension_numbers = #tpu.dot_dimension_numbers<[1], [0], [0], [1], [0, 0, 1, 1], [], []>} : vector<8x32xf32>, vector<32x32xf32>, vector<8x32xf32> -> vector<8x32xf32>
    %68 = arith.addf %66, %67 : vector<8x32xf32>
    %69 = math.tanh %68 : vector<8x32xf32>
    %c0_42 = arith.constant 0 : index
    %c64 = arith.constant 64 : index
    %70 = vector.load %arg16[%c0_42, %c64] : memref<8x256xf32, #tpu.memory_space<vmem>>, vector<8x32xf32>
    tpu.vector_store %arg16[%c0_42, %c64], %69 {strides = array<i32>} : memref<8x256xf32, #tpu.memory_space<vmem>>, vector<8x32xf32>,
    %71 = vector.extract_strided_slice %53 {offsets = [24, 0], sizes = [8, 32], strides = [1, 1]} : vector<64x32xf32> to vector<8x32xf32>
    %cst_43 = arith.constant dense<0.000000e+00> : vector<8x32xf32>
    %72 = tpu.matmul %69, %54, %cst_43 {dimension_numbers = #tpu.dot_dimension_numbers<[1], [0], [0], [1], [0, 0, 1, 1], [], []>} : vector<8x32xf32>, vector<32x32xf32>, vector<8x32xf32> -> vector<8x32xf32>
    %73 = arith.addf %71, %72 : vector<8x32xf32>
    %74 = math.tanh %73 : vector<8x32xf32>
    %c0_44 = arith.constant 0 : index
    %c96 = arith.constant 96 : index
    %75 = vector.load %arg16[%c0_44, %c96] : memref<8x256xf32, #tpu.memory_space<vmem>>, vector<8x32xf32>
    tpu.vector_store %arg16[%c0_44, %c96], %74 {strides = array<i32>} : memref<8x256xf32, #tpu.memory_space<vmem>>, vector<8x32xf32>,
    %76 = vector.extract_strided_slice %53 {offsets = [32, 0], sizes = [8, 32], strides = [1, 1]} : vector<64x32xf32> to vector<8x32xf32>
    %cst_45 = arith.constant dense<0.000000e+00> : vector<8x32xf32>
    %77 = tpu.matmul %74, %54, %cst_45 {dimension_numbers = #tpu.dot_dimension_numbers<[1], [0], [0], [1], [0, 0, 1, 1], [], []>} : vector<8x32xf32>, vector<32x32xf32>, vector<8x32xf32> -> vector<8x32xf32>
    %78 = arith.addf %76, %77 : vector<8x32xf32>
    %79 = math.tanh %78 : vector<8x32xf32>
    %c0_46 = arith.constant 0 : index
    %c128 = arith.constant 128 : index
    %80 = vector.load %arg16[%c0_46, %c128] : memref<8x256xf32, #tpu.memory_space<vmem>>, vector<8x32xf32>
    tpu.vector_store %arg16[%c0_46, %c128], %79 {strides = array<i32>} : memref<8x256xf32, #tpu.memory_space<vmem>>, vector<8x32xf32>,
    %81 = vector.extract_strided_slice %53 {offsets = [40, 0], sizes = [8, 32], strides = [1, 1]} : vector<64x32xf32> to vector<8x32xf32>
    %cst_47 = arith.constant dense<0.000000e+00> : vector<8x32xf32>
    %82 = tpu.matmul %79, %54, %cst_47 {dimension_numbers = #tpu.dot_dimension_numbers<[1], [0], [0], [1], [0, 0, 1, 1], [], []>} : vector<8x32xf32>, vector<32x32xf32>, vector<8x32xf32> -> vector<8x32xf32>
    %83 = arith.addf %81, %82 : vector<8x32xf32>
    %84 = math.tanh %83 : vector<8x32xf32>
    %c0_48 = arith.constant 0 : index
    %c160 = arith.constant 160 : index
    %85 = vector.load %arg16[%c0_48, %c160] : memref<8x256xf32, #tpu.memory_space<vmem>>, vector<8x32xf32>
    tpu.vector_store %arg16[%c0_48, %c160], %84 {strides = array<i32>} : memref<8x256xf32, #tpu.memory_space<vmem>>, vector<8x32xf32>,
    %86 = vector.extract_strided_slice %53 {offsets = [48, 0], sizes = [8, 32], strides = [1, 1]} : vector<64x32xf32> to vector<8x32xf32>
    %cst_49 = arith.constant dense<0.000000e+00> : vector<8x32xf32>
    %87 = tpu.matmul %84, %54, %cst_49 {dimension_numbers = #tpu.dot_dimension_numbers<[1], [0], [0], [1], [0, 0, 1, 1], [], []>} : vector<8x32xf32>, vector<32x32xf32>, vector<8x32xf32> -> vector<8x32xf32>
    %88 = arith.addf %86, %87 : vector<8x32xf32>
    %89 = math.tanh %88 : vector<8x32xf32>
    %c0_50 = arith.constant 0 : index
    %c192 = arith.constant 192 : index
    %90 = vector.load %arg16[%c0_50, %c192] : memref<8x256xf32, #tpu.memory_space<vmem>>, vector<8x32xf32>
    tpu.vector_store %arg16[%c0_50, %c192], %89 {strides = array<i32>} : memref<8x256xf32, #tpu.memory_space<vmem>>, vector<8x32xf32>,
    %91 = vector.extract_strided_slice %53 {offsets = [56, 0], sizes = [8, 32], strides = [1, 1]} : vector<64x32xf32> to vector<8x32xf32>
    %cst_51 = arith.constant dense<0.000000e+00> : vector<8x32xf32>
    %92 = tpu.matmul %89, %54, %cst_51 {dimension_numbers = #tpu.dot_dimension_numbers<[1], [0], [0], [1], [0, 0, 1, 1], [], []>} : vector<8x32xf32>, vector<32x32xf32>, vector<8x32xf32> -> vector<8x32xf32>
    %93 = arith.addf %91, %92 : vector<8x32xf32>
    %94 = math.tanh %93 : vector<8x32xf32>
    %c0_52 = arith.constant 0 : index
    %c224 = arith.constant 224 : index
    %95 = vector.load %arg16[%c0_52, %c224] : memref<8x256xf32, #tpu.memory_space<vmem>>, vector<8x32xf32>
    tpu.vector_store %arg16[%c0_52, %c224], %94 {strides = array<i32>} : memref<8x256xf32, #tpu.memory_space<vmem>>, vector<8x32xf32>,
    %c0_53 = arith.constant 0 : index
    %c0_54 = arith.constant 0 : index
    %96 = vector.load %arg16[%c0_53, %c0_54] : memref<8x256xf32, #tpu.memory_space<vmem>>, vector<8x256xf32>
    %c0_55 = arith.constant 0 : index
    %c0_56 = arith.constant 0 : index
    %97 = vector.load %arg8[%c0_55, %c0_56] : memref<256x128xf32, #tpu.memory_space<vmem>>, vector<256x128xf32>
    %cst_57 = arith.constant dense<0.000000e+00> : vector<8x128xf32>
    %98 = tpu.matmul %96, %97, %cst_57 {dimension_numbers = #tpu.dot_dimension_numbers<[1], [0], [0], [1], [0, 0, 1, 1], [], []>} : vector<8x256xf32>, vector<256x128xf32>, vector<8x128xf32> -> vector<8x128xf32>
    %c0_58 = arith.constant 0 : index
    %c0_59 = arith.constant 0 : index
    %99 = vector.load %arg9[%c0_58, %c0_59] : memref<1x128xf32, #tpu.memory_space<vmem>>, vector<1x128xf32>
    %100 = vector.broadcast %99 : vector<1x128xf32> to vector<8x128xf32>
    %101 = arith.addf %98, %100 : vector<8x128xf32>
    %cst_60 = arith.constant 0.000000e+00 : f32
    %102 = vector.broadcast %cst_60 : f32 to vector<8x128xf32>
    %103 = arith.maximumf %101, %102 : vector<8x128xf32>
    %c0_61 = arith.constant 0 : index
    %c0_62 = arith.constant 0 : index
    %104 = vector.load %arg10[%c0_61, %c0_62] : memref<128x64xf32, #tpu.memory_space<vmem>>, vector<128x64xf32>
    %cst_63 = arith.constant dense<0.000000e+00> : vector<8x64xf32>
    %105 = tpu.matmul %103, %104, %cst_63 {dimension_numbers = #tpu.dot_dimension_numbers<[1], [0], [0], [1], [0, 0, 1, 1], [], []>} : vector<8x128xf32>, vector<128x64xf32>, vector<8x64xf32> -> vector<8x64xf32>
    %c0_64 = arith.constant 0 : index
    %c0_65 = arith.constant 0 : index
    %106 = vector.load %arg11[%c0_64, %c0_65] : memref<1x64xf32, #tpu.memory_space<vmem>>, vector<1x64xf32>
    %107 = vector.broadcast %106 : vector<1x64xf32> to vector<8x64xf32>
    %108 = arith.addf %105, %107 : vector<8x64xf32>
    %cst_66 = arith.constant 0.000000e+00 : f32
    %109 = vector.broadcast %cst_66 : f32 to vector<8x64xf32>
    %110 = arith.maximumf %108, %109 : vector<8x64xf32>
    %c0_67 = arith.constant 0 : index
    %c0_68 = arith.constant 0 : index
    %111 = vector.load %arg12[%c0_67, %c0_68] : memref<64x1xf32, #tpu.memory_space<vmem>>, vector<64x1xf32>
    %cst_69 = arith.constant dense<0.000000e+00> : vector<8x1xf32>
    %112 = tpu.matmul %110, %111, %cst_69 {dimension_numbers = #tpu.dot_dimension_numbers<[1], [0], [0], [1], [0, 0, 1, 1], [], []>} : vector<8x64xf32>, vector<64x1xf32>, vector<8x1xf32> -> vector<8x1xf32>
    %c0_70 = arith.constant 0 : index
    %c0_71 = arith.constant 0 : index
    %113 = vector.load %arg13[%c0_70, %c0_71] : memref<1x1xf32, #tpu.memory_space<vmem>>, vector<1x1xf32>
    %114 = vector.broadcast %113 : vector<1x1xf32> to vector<8x1xf32>
    %115 = arith.addf %112, %114 : vector<8x1xf32>
    %cst_72 = arith.constant 5.000000e-01 : f32
    %116 = vector.broadcast %cst_72 : f32 to vector<8x1xf32>
    %117 = arith.mulf %116, %115 : vector<8x1xf32>
    %118 = math.tanh %117 : vector<8x1xf32>
    %cst_73 = arith.constant 1.000000e+00 : f32
    %119 = vector.broadcast %cst_73 : f32 to vector<8x1xf32>
    %120 = arith.addf %118, %119 : vector<8x1xf32>
    %cst_74 = arith.constant 5.000000e-01 : f32
    %121 = vector.broadcast %cst_74 : f32 to vector<8x1xf32>
    %122 = arith.mulf %121, %120 : vector<8x1xf32>
    %c0_75 = arith.constant 0 : index
    %c0_76 = arith.constant 0 : index
    %123 = vector.load %arg14[%c0_75, %c0_76] : memref<8x1xf32, #tpu.memory_space<vmem>>, vector<8x1xf32>
    tpu.vector_store %arg14[%c0_75, %c0_76], %122 {strides = array<i32>} : memref<8x1xf32, #tpu.memory_space<vmem>>, vector<8x1xf32>,
    return
  }
  func.func @transform_0(%arg0: i32) -> (i32, i32) {
    %c0_i32 = arith.constant 0 : i32
    %c0_i32_0 = arith.constant 0 : i32
    %c0_i32_1 = arith.constant 0 : i32
    return %c0_i32, %c0_i32_0 : i32, i32
  }
  func.func @transform_1(%arg0: i32) -> (i32, i32) {
    %c0_i32 = arith.constant 0 : i32
    %c0_i32_0 = arith.constant 0 : i32
    %c0_i32_1 = arith.constant 0 : i32
    return %c0_i32, %c0_i32_0 : i32, i32
  }
  func.func @transform_2(%arg0: i32) -> (i32, i32) {
    %c0_i32 = arith.constant 0 : i32
    %c0_i32_0 = arith.constant 0 : i32
    %c0_i32_1 = arith.constant 0 : i32
    return %c0_i32, %c0_i32_0 : i32, i32
  }
  func.func @transform_3(%arg0: i32) -> (i32, i32) {
    %c0_i32 = arith.constant 0 : i32
    %c0_i32_0 = arith.constant 0 : i32
    %c0_i32_1 = arith.constant 0 : i32
    return %c0_i32, %c0_i32_0 : i32, i32
  }
  func.func @transform_4(%arg0: i32) -> (i32, i32) {
    %c0_i32 = arith.constant 0 : i32
    %c0_i32_0 = arith.constant 0 : i32
    %c0_i32_1 = arith.constant 0 : i32
    return %c0_i32, %c0_i32_0 : i32, i32
  }
  func.func @transform_5(%arg0: i32) -> (i32, i32) {
    %c0_i32 = arith.constant 0 : i32
    %c0_i32_0 = arith.constant 0 : i32
    %c0_i32_1 = arith.constant 0 : i32
    return %c0_i32, %c0_i32_0 : i32, i32
  }
  func.func @transform_6(%arg0: i32) -> (i32, i32) {
    %c0_i32 = arith.constant 0 : i32
    %c0_i32_0 = arith.constant 0 : i32
    %c0_i32_1 = arith.constant 0 : i32
    return %c0_i32, %c0_i32_0 : i32, i32
  }
  func.func @transform_7(%arg0: i32) -> (i32, i32) {
    %c0_i32 = arith.constant 0 : i32
    %c0_i32_0 = arith.constant 0 : i32
    %c0_i32_1 = arith.constant 0 : i32
    return %c0_i32, %c0_i32_0 : i32, i32
  }
  func.func @transform_8(%arg0: i32) -> (i32, i32) {
    %c0_i32 = arith.constant 0 : i32
    %c0_i32_0 = arith.constant 0 : i32
    %c0_i32_1 = arith.constant 0 : i32
    return %c0_i32, %c0_i32_0 : i32, i32
  }
  func.func @transform_9(%arg0: i32) -> (i32, i32) {
    %c0_i32 = arith.constant 0 : i32
    %c0_i32_0 = arith.constant 0 : i32
    %c0_i32_1 = arith.constant 0 : i32
    return %c0_i32, %c0_i32_0 : i32, i32
  }
  func.func @transform_10(%arg0: i32) -> (i32, i32) {
    %c0_i32 = arith.constant 0 : i32
    %c0_i32_0 = arith.constant 0 : i32
    %c0_i32_1 = arith.constant 0 : i32
    return %c0_i32, %c0_i32_0 : i32, i32
  }
  func.func @transform_11(%arg0: i32) -> (i32, i32) {
    %c0_i32 = arith.constant 0 : i32
    %c0_i32_0 = arith.constant 0 : i32
    %c0_i32_1 = arith.constant 0 : i32
    return %c0_i32, %c0_i32_0 : i32, i32
  }
  func.func @transform_12(%arg0: i32) -> (i32, i32) {
    %c0_i32 = arith.constant 0 : i32
    %c0_i32_0 = arith.constant 0 : i32
    %c0_i32_1 = arith.constant 0 : i32
    return %c0_i32, %c0_i32_0 : i32, i32
  }
  func.func @transform_13(%arg0: i32) -> (i32, i32) {
    %c0_i32 = arith.constant 0 : i32
    %c0_i32_0 = arith.constant 0 : i32
    %c0_i32_1 = arith.constant 0 : i32
    return %c0_i32, %c0_i32_0 : i32, i32
  }
}

</mosaic_0001>

<bundles_post_ra>
// kernel: tpu_custom_call.1
= control target key start
LH: loop header
LB: loop body
LE: loop exit
PB: predicated region body
PF: predicated region fallthrough
CT: control target
= control target key end

     0   :  { %s3257_s0 = inlined_call_operand.vmem [shape: f32[64,4], index: 0, kind: input, shape index: {}]   ;;  %s3258_s1 = inlined_call_operand.vmem [shape: f32[4,32], index: 1, kind: input, shape index: {}]   ;;  %s3259_s2 = inlined_call_operand.vmem [shape: f32[32,32], index: 2, kind: input, shape index: {}]   ;;  %s3260_s3 = inlined_call_operand.vmem [shape: f32[1,32], index: 3, kind: input, shape index: {}]   ;;  %s3261_s4 = inlined_call_operand.hbm [shape: f32[32,32], index: 4, kind: input, shape index: {}]   ;;  %s3262_s5 = inlined_call_operand.hbm [shape: f32[32,32], index: 5, kind: input, shape index: {}]   ;;  %s3263_s6 = inlined_call_operand.vmem [shape: f32[1,32], index: 6, kind: input, shape index: {}]   ;;  %s3264_s7 = inlined_call_operand.vmem [shape: f32[256,128], index: 7, kind: input, shape index: {}]   ;;  %s3265_s8 = inlined_call_operand.hbm [shape: f32[1,128], index: 8, kind: input, shape index: {}]   ;;  %s3266_s9 = inlined_call_operand.vmem [shape: f32[128,64], index: 9, kind: input, shape index: {}]   ;;  %s3267_s10 = inlined_call_operand.vmem [shape: f32[1,64], index: 10, kind: input, shape index: {}]   ;;  %s3268_s11 = inlined_call_operand.vmem [shape: f32[64,1], index: 11, kind: input, shape index: {}]   ;;  %s3269_s12 = inlined_call_operand.<no memory space> [shape: f32[1,1], index: 12, kind: input, shape index: {}]   ;;  %s3270_s13 = inlined_call_operand.vmem [shape: f32[8,1], index: 13, kind: output, shape index: {}]  }
   0x1   :  { %v18_v0 = vstv %s3269_s12 }
   0x2   :  { %19 = vst [vmem:[#allocation4] sm:$0x1] %v18_v0 }
   0x3   :  { %20 = vsyncpa [#allocation6], 0 }
   0x4   :  { %21 = vsyncpa [#allocation8], 0  ;;  %s2686_s27 = smov [#allocation7]   ;;  %s2687_s29 = smov [#allocation5]  }
   0x5   :  { %s47_s28 = sshll.u32 %s2686_s27, 4  ;;  %s35_s30 = sshll.u32 %s2687_s29, 4  ;;  %s48_s28 = int_to_ptr.vmem [resolvable:$true] %s47_s28  ;;  %s2770_s30 = int_to_ptr.vmem [resolvable:$true] %s35_s30 }
   0x6   :  { %s2616_s16 = scalar_lea.hbm %s3262_s5, 512 }
   0x7   :  { %p2617_p0 = scmp.ne.s32.totalorder %s3262_s5, %s2616_s16  ;;  %p2620_p1 = scmp.lt.u32.totalorder %s2616_s16, %s3262_s5 }
   0x9   :  { %p2622_p2 = pnand %p2620_p1, %p2617_p0 }
   0xb   :  { %2625 = shalt.err (!%p2622_p2)
}
   0xc   :  { %s2626_s20 = scalar_lea.vmem %s48_s28, 512  ;;  %p2631_p4 = scmp.lt.s32.totalorder %s48_s28, %s48_s28 }
   0xd   :  { %p2627_p3 = scmp.ne.s32.totalorder %s48_s28, %s2626_s20  ;;  %p2632_p5 = scmp.lt.s32.totalorder %s2626_s20, %s2626_s20 }
   0xf   :  { %p2633_p6 = por %p2632_p5, %p2631_p4 }
  0x11   :  { %p2634_p7 = pnand %p2633_p6, %p2627_p3 }
  0x13   :  { %2637 = shalt.err (!%p2634_p7)
}
  0x14   :  { %s2688_s21 = smov 128   ;;  %s2689_s22 = smov 8  }
  0x15   :  { %53 = dma.hbm_to_vmem [thread:$0]  %s3262_s5, 512, %s48_s28, [#allocation8], %s2688_s21, %s2688_s21, %s2689_s22  }
  0x16   :  { %s2638_s27 = scalar_lea.hbm %s3261_s4, 512 }
  0x17   :  { %p2639_p8 = scmp.ne.s32.totalorder %s3261_s4, %s2638_s27  ;;  %p2642_p9 = scmp.lt.u32.totalorder %s2638_s27, %s3261_s4 }
  0x19   :  { %p2644_p10 = pnand %p2642_p9, %p2639_p8 }
  0x1b   :  { %2647 = shalt.err (!%p2644_p10)
}
  0x1c   :  { %s2648_s17 = scalar_lea.vmem %s2770_s30, 512  ;;  %p2653_p12 = scmp.lt.s32.totalorder %s2770_s30, %s2770_s30 }
  0x1d   :  { %p2649_p11 = scmp.ne.s32.totalorder %s2770_s30, %s2648_s17  ;;  %p2654_p13 = scmp.lt.s32.totalorder %s2648_s17, %s2648_s17 }
  0x1f   :  { %p2655_p0 = por %p2654_p13, %p2653_p12 }
  0x21   :  { %p2656_p1 = pnand %p2655_p0, %p2649_p11 }
  0x23   :  { %2659 = shalt.err (!%p2656_p1)
}
  0x24   :  { %41 = dma.hbm_to_vmem [thread:$0]  %s3261_s4, 512, %s2770_s30, [#allocation6], %s2688_s21, %s2688_s21, %s2689_s22  }
  0x25   :  { %s2690_s18 = smov [#allocation9]   ;;  %s2660_s23 = scalar_lea.hbm %s3265_s8, 16 }
  0x26   :  { %s64_s19 = sshll.u32 %s2690_s18, 4  ;;  %p2661_p2 = scmp.ne.s32.totalorder %s3265_s8, %s2660_s23  ;;  %s65_s19 = int_to_ptr.vmem [resolvable:$true] %s64_s19 }
  0x27   :  { %p2664_p3 = scmp.lt.u32.totalorder %s2660_s23, %s3265_s8 }
  0x29   :  { %p2666_p4 = pnand %p2664_p3, %p2661_p2 }
  0x2b   :  { %2669 = shalt.err (!%p2666_p4)
}
  0x2c   :  { %s2670_s29 = scalar_lea.vmem %s65_s19, 16  ;;  %s2674_s4 = scalar_lea.vmem %s65_s19, 32 }
  0x2d   :  { %p2671_p5 = scmp.ne.s32.totalorder %s65_s19, %s2670_s29  ;;  %p2675_p6 = scmp.lt.s32.totalorder %s65_s19, %s65_s19 }
  0x2e   :  { %p2676_p7 = scmp.lt.s32.totalorder %s2674_s4, %s2670_s29 }
  0x30   :  { %p2677_p8 = por %p2676_p7, %p2675_p6 }
  0x32   :  { %p2678_p9 = pnand %p2677_p8, %p2671_p5 }
  0x34   :  { %2681 = shalt.err (!%p2678_p9)
}
  0x35   :  { %67 = dma.hbm_to_vmem [thread:$0]  %s3265_s8, 16, %s65_s19, [#allocation8]  }
  0x36   :  { %2682 = dma.done.wait [#allocation6], 512  }
  0x37   :  { %2683 = vsyncadd [#allocation6], 4294966784 }
  0x38   :  { %2684 = dma.done.wait [#allocation8], 528  }
  0x39   :  { %2685 = vsyncadd [#allocation8], 4294966768  ;;  %vm126_vm0 = vcmask 1043456   ;;  %vm101_vm1 = vcmask 31744   ;;  %v93_v1 = vld [vmem:[%s3258_s1] sm:$0xf] }
  0x3a   :  { %v89_v2 = vld [vmem:[%s3257_s0 + $0x20] sm:$0xff]  ;;  %v90_v3 = vld [vmem:[%s3257_s0 + $0x28] sm:$0xff]  ;;  %2569 = vmatprep.subr.msk.mxu1 %vm126_vm0, %v93_v1  ;;  %v91_v6 = vld [vmem:[%s3257_s0 + $0x30] sm:$0xff]  ;;  %2133 = vmatprep.subr.msk.mxu0 %vm126_vm0, %v93_v1  ;;  %v2691_v9 = vmov 0.0|0.0   ;;  %vm2692_vm2 = vmmov 0   ;;  %v2693_v15 = vmov 0.0  }
  0x3b   :  { %2141 = vmatprep.mubr.msk.f32.mxu1 %vm101_vm1, %v89_v2  ;;  %v235_v4 = vld [vmem:[%s3259_s2] sm:$0xff]  ;;  %v236_v5 = vld [vmem:[%s3259_s2 + $0x8] sm:$0xff]  ;;  %2570 = vmatpush3.msk.msra.mxu1 %vm126_vm0, %v93_v1  ;;  %v237_v11 = vld [vmem:[%s3259_s2 + $0x10] sm:$0xff]  ;;  %vm239_vm3 = vcmask 261120   ;;  %vm1152_vm4 = vcmask 523520   ;;  %s2695_s5 = smov 64  }
  0x3c   :  { %v2834_v7 = vpack.c.bf16 %v236_v5, %v235_v4  ;;  %v85_v8 = vld [vmem:[%s3257_s0] sm:$0xff]  ;;  %2142 = vmatmul.mubr.msk.f32.vlgmr.msra.gmra.mrb[0].mxu1 %vm101_vm1, %v90_v3  ;;  %2397 = vmatprep.subr.bf16.mxu1 %v2691_v9  ;;  %v86_v10 = vld [vmem:[%s3257_s0 + $0x8] sm:$0xff]  ;;  %v238_v12 = vld [vmem:[%s3259_s2 + $0x18] sm:$0xff]  ;;  %vm1232_vm5 = vcmask 785920   ;;  %s2696_s8 = smov 96   ;;  %vm1312_vm6 = vcmask 1048320  }
  0x3d   :  { %2144 = vmatprep.mubr.msk.f32.mxu1 %vm101_vm1, %v91_v6  ;;  %v92_v13 = vld [vmem:[%s3257_s0 + $0x38] sm:$0xff]  ;;  %v2856_v14 = vpack.c.bf16 %v238_v12, %v237_v11  ;;  %2134 = vmatpush3.msk.msra.mxu0 %vm126_vm0, %v93_v1  ;;  %v2886_v19 = vld [vmem:[%s3260_s3] ss:$0 sm:$0xff]  ;;  %v87_v28 = vld [vmem:[%s3257_s0 + $0x10] sm:$0xff]  ;;  %vm1848_vm7 = vcmask 523264   ;;  %vm1926_vm8 = vcmask 7168  }
  0x3e   :  { %2399 = vmatpush3.bf16.msra.mxu1 %v2834_v7  ;;  %2135 = vmatprep.mubr.msk.f32.mxu0 %vm101_vm1, %v85_v8  ;;  %v88_v29 = vld [vmem:[%s3257_s0 + $0x18] sm:$0xff]  ;;  %v858_v59 = vld [vmem:[#allocation5 + $0x10] sm:$0xff]  ;;  %v859_v60 = vld [vmem:[#allocation5 + $0x18] sm:$0xff] }
  0x3f   :  { %2400 = vmatprep.subr.bf16.mxu1 %v2691_v9  ;;  %2136 = vmatmul.mubr.msk.f32.vlgmr.msra.gmra.mrb[0].mxu0 %vm101_vm1, %v86_v10  ;;  %v856_v52 = vld [vmem:[#allocation5] sm:$0xff]  ;;  %v857_v53 = vld [vmem:[#allocation5 + $0x8] sm:$0xff]  ;;  %v2449_v61 = vpack.c.bf16 %v859_v60, %v858_v59  ;;  %v998_v8 = vld [vmem:[#allocation7 + $0x10] sm:$0xff] }
  0x40   :  { %2145 = vmatmul.mubr.msk.f32.gmra.mrb[2].mxu1 %vm101_vm1, %v92_v13  ;;  %2409 = vmatprep.subr.bf16.mxu0 %v2691_v9  ;;  %v2445_v54 = vpack.c.bf16 %v857_v53, %v856_v52  ;;  %v996_v5 = vld [vmem:[#allocation7] sm:$0xff]  ;;  %v997_v6 = vld [vmem:[#allocation7 + $0x8] sm:$0xff]  ;;  %v999_v10 = vld [vmem:[#allocation7 + $0x18] sm:$0xff] }
  0x41   :  { %2155 = vmatprep.mubr.msk.f32.mxu1 %vm2692_vm2, %v2693_v15  ;;  %2411 = vmatpush3.bf16.msra.mxu0 %v2834_v7  ;;  %v2962_v11 = vpack.c.bf16 %v999_v10, %v998_v8  ;;  %v1645_v8 = vld [vmem:[%s3264_s7 + $0x80] sm:$0xff]  ;;  %v1646_v10 = vld [vmem:[%s3264_s7 + $0x88] sm:$0xff] }
  0x42   :  { %2402 = vmatpush3.bf16.msra.mxu1 %v2856_v14  ;;  %2412 = vmatprep.subr.bf16.mxu0 %v2691_v9 }
  0x43   :  { %2403 = vmatprep.subr.bf16.mxu1 %v2691_v9  ;;  %2138 = vmatprep.mubr.msk.f32.mxu0 %vm101_vm1, %v87_v28 }
  0x44   :  { %2139 = vmatmul.mubr.msk.f32.gmra.mrb[2].mxu0 %vm101_vm1, %v88_v29 }
  0x45   :  { %2156 = vmatmul.mubr.f32.vlgmr.msra.gmra.mrb[4].mxu1 %v2693_v15  ;;  %2414 = vmatpush3.bf16.msra.mxu0 %v2856_v14 }
  0x46   :  { %2405 = vmatpush3.bf16.msra.mxu1 %v2834_v7  ;;  %2166 = vmatprep.mubr.msk.f32.mxu1 %vm2692_vm2, %v2693_v15 }
  0x47   :  { %2406 = vmatprep.subr.bf16.mxu1 %v2691_v9  ;;  %2421 = vmatprep.subr.bf16.mxu0 %v2691_v9 }
  0x48   :  { %2177 = vmatprep.mubr.msk.f32.mxu0 %vm2692_vm2, %v2693_v15 }
  0x4a   :  { %2408 = vmatpush3.bf16.msra.mxu1 %v2856_v14 }
  0x4b   :  { %2415 = vmatprep.subr.bf16.mxu1 %v2691_v9 }
 0x10f   :  { %v2879_v16 = vpop.f32.mrb[0].mxu1 }
 0x110   :  { %v2881_v17 = vpop.f32.mrb[1].mxu1  ;;  %v222_v55 = vadd.f32 %v2879_v16, %v2886_v19 }
 0x111   :  { %v217_v47 = vadd.f32 %v2886_v19, %v2881_v17 }
 0x112   :  { %v2137_v18 = vpop.f32.mrb[0].mxu0 }
 0x113   :  { %v2888_v20 = vpop.f32.mrb[2].mxu1  ;;  %v196_v21 = vpop.f32.mrb[1].mxu0  ;;  %v202_v30 = vadd.f32 %v2137_v18, %v2886_v19 }
 0x114   :  { %v2890_v22 = vpop.f32.mrb[3].mxu1  ;;  %v197_v23 = vadd.f32 %v2886_v19, %v196_v21 }
 0x115   :  { %v227_v12 = vadd.f32 %v2886_v19, %v2890_v22 }
 0x117   :  { %v2140_v35 = vpop.f32.mrb[2].mxu0 }
 0x118   :  { %v309_v24 = vpop.f32.mrb[4].mxu1  ;;  %v206_v36 = vpop.f32.mrb[3].mxu0  ;;  %v212_v42 = vadd.f32 %v2140_v35, %v2886_v19 }
 0x119   :  { %v313_v25 = vadd.f32 %v309_v24, %v197_v23  ;;  %v2157_v26 = vpop.f32.mrb[5].mxu1  ;;  %v207_v37 = vadd.f32 %v2886_v19, %v206_v36 }
 0x11b   :  { %2582 = vtanh.f32 %v313_v25 }
 0x125   :  { %v2583_v27 = vpop.eup %2582 }
 0x126   :  { %315 = vst.msk [vmem:[#allocation2] sm:$0xff] %vm239_vm3, %v2583_v27  ;;  %2167 = vmatmul.mubr.msk.f32.vlgmr.msra.gmra.mrb[6].mxu1 %vm239_vm3, %v2583_v27  ;;  %v232_v27 = vadd.f32 %v2888_v20, %v2886_v19 }
 0x127   :  { %2417 = vmatpush3.bf16.msra.mxu1 %v2834_v7  ;;  %2188 = vmatprep.mubr.msk.f32.mxu1 %vm2692_vm2, %v2693_v15 }
 0x128   :  { %2418 = vmatprep.subr.bf16.mxu1 %v2691_v9 }
 0x12b   :  { %2420 = vmatpush3.bf16.msra.mxu1 %v2856_v14 }
 0x12c   :  { %2427 = vmatprep.subr.bf16.mxu1 %v2691_v9 }
 0x12d   :  { %v848_v63 = vld [vmem:[#allocation2] sm:$0xff] }
 0x1f9   :  { %v385_v31 = vpop.f32.mrb[6].mxu1 }
 0x1fa   :  { %v389_v32 = vadd.f32 %v385_v31, %v202_v30  ;;  %v2168_v33 = vpop.f32.mrb[7].mxu1  ;;  %v2995_v31 = vld [vmem:[%s3263_s6] ss:$0 sm:$0xff]  ;;  %s2694_s6 = smov 32  }
 0x1fc   :  { %2584 = vtanh.f32 %v389_v32 }
 0x206   :  { %v2585_v34 = vpop.eup %2584 }
 0x207   :  { %391 = vst.msk [vmem:[#allocation2 + $0x8] sm:$0xff] %vm239_vm3, %v2585_v34  ;;  %2178 = vmatmul.mubr.msk.f32.vlgmr.msra.gmra.mrb[4].mxu0 %vm239_vm3, %v2585_v34 }
 0x208   :  { %2423 = vmatpush3.bf16.msra.mxu0 %v2834_v7  ;;  %2199 = vmatprep.mubr.msk.f32.mxu0 %vm2692_vm2, %v2693_v15 }
 0x209   :  { %2424 = vmatprep.subr.bf16.mxu0 %v2691_v9 }
 0x20c   :  { %2426 = vmatpush3.bf16.msra.mxu0 %v2856_v14 }
 0x20d   :  { %2433 = vmatprep.subr.bf16.mxu0 %v2691_v9 }
 0x20e   :  { %v849_v0 = vld [vmem:[#allocation2 + $0x8] sm:$0xff] }
 0x2da   :  { %v461_v38 = vpop.f32.mrb[4].mxu0 }
 0x2db   :  { %v465_v39 = vadd.f32 %v461_v38, %v207_v37  ;;  %v2179_v40 = vpop.f32.mrb[5].mxu0 }
 0x2dd   :  { %2586 = vtanh.f32 %v465_v39 }
 0x2e7   :  { %v2587_v41 = vpop.eup %2586 }
 0x2e8   :  { %467 = vst.msk [vmem:[#allocation2 + $0x10] sm:$0xff] %vm239_vm3, %v2587_v41  ;;  %2189 = vmatmul.mubr.msk.f32.vlgmr.msra.gmra.mrb[8].mxu1 %vm239_vm3, %v2587_v41 }
 0x2e9   :  { %2429 = vmatpush3.bf16.msra.mxu1 %v2834_v7  ;;  %2210 = vmatprep.mubr.msk.f32.mxu1 %vm2692_vm2, %v2693_v15 }
 0x2ea   :  { %2430 = vmatprep.subr.bf16.mxu1 %v2691_v9 }
 0x2ed   :  { %2432 = vmatpush3.bf16.msra.mxu1 %v2856_v14 }
 0x2ee   :  { %2439 = vmatprep.subr.bf16.mxu1 %v2691_v9 }
 0x2ef   :  { %v850_v1 = vld [vmem:[#allocation2 + $0x10] sm:$0xff] }
 0x3bb   :  { %v537_v43 = vpop.f32.mrb[8].mxu1 }
 0x3bc   :  { %v541_v44 = vadd.f32 %v537_v43, %v212_v42  ;;  %v2190_v45 = vpop.f32.mrb[9].mxu1 }
 0x3be   :  { %2588 = vtanh.f32 %v541_v44 }
 0x3c8   :  { %v2589_v46 = vpop.eup %2588 }
 0x3c9   :  { %543 = vst.msk [vmem:[#allocation2 + $0x18] sm:$0xff] %vm239_vm3, %v2589_v46  ;;  %2200 = vmatmul.mubr.msk.f32.vlgmr.msra.gmra.mrb[6].mxu0 %vm239_vm3, %v2589_v46 }
 0x3ca   :  { %2435 = vmatpush3.bf16.msra.mxu0 %v2834_v7  ;;  %2221 = vmatprep.mubr.msk.f32.mxu0 %vm2692_vm2, %v2693_v15 }
 0x3cb   :  { %2436 = vmatprep.subr.bf16.mxu0 %v2691_v9 }
 0x3ce   :  { %2438 = vmatpush3.bf16.msra.mxu0 %v2856_v14 }
 0x3cf   :  { %2446 = vmatprep.subr.bf16.mxu0 %v2445_v54 }
 0x3d0   :  { %v851_v2 = vld [vmem:[#allocation2 + $0x18] sm:$0xff] }
 0x49c   :  { %v613_v48 = vpop.f32.mrb[6].mxu0 }
 0x49d   :  { %v617_v49 = vadd.f32 %v613_v48, %v217_v47  ;;  %v2201_v50 = vpop.f32.mrb[7].mxu0 }
 0x49f   :  { %2590 = vtanh.f32 %v617_v49 }
 0x4a9   :  { %v2591_v51 = vpop.eup %2590 }
 0x4aa   :  { %619 = vst.msk [vmem:[#allocation2 + $0x20] sm:$0xff] %vm239_vm3, %v2591_v51  ;;  %2211 = vmatmul.mubr.msk.f32.vlgmr.msra.gmra.mrb[10].mxu1 %vm239_vm3, %v2591_v51 }
 0x4ab   :  { %2441 = vmatpush3.bf16.msra.mxu1 %v2834_v7  ;;  %2232 = vmatprep.mubr.msk.f32.mxu1 %vm2692_vm2, %v2693_v15  ;;  %v2958_v7 = vpack.c.bf16 %v997_v6, %v996_v5 }
 0x4ac   :  { %2442 = vmatprep.subr.bf16.mxu1 %v2691_v9 }
 0x4af   :  { %2444 = vmatpush3.bf16.msra.mxu1 %v2856_v14 }
 0x4b0   :  { %2453 = vmatprep.subr.bf16.mxu1 %v2691_v9 }
 0x4b1   :  { %v852_v3 = vld [vmem:[#allocation2 + $0x20] sm:$0xff] }
 0x57d   :  { %v689_v56 = vpop.f32.mrb[10].mxu1 }
 0x57e   :  { %v693_v57 = vadd.f32 %v689_v56, %v222_v55  ;;  %v2212_v58 = vpop.f32.mrb[11].mxu1 }
 0x580   :  { %2592 = vtanh.f32 %v693_v57 }
 0x58a   :  { %v2593_v62 = vpop.eup %2592 }
 0x58b   :  { %695 = vst.msk [vmem:[#allocation2 + $0x28] sm:$0xff] %vm239_vm3, %v2593_v62  ;;  %2222 = vmatmul.mubr.msk.f32.vlgmr.msra.gmra.mrb[8].mxu0 %vm239_vm3, %v2593_v62 }
 0x58c   :  { %2448 = vmatpush3.bf16.msra.mxu0 %v2445_v54  ;;  %2243 = vmatprep.mubr.msk.f32.mxu0 %vm239_vm3, %v848_v63 }
 0x58d   :  { %2450 = vmatprep.subr.bf16.mxu0 %v2449_v61 }
 0x590   :  { %2452 = vmatpush3.bf16.msra.mxu0 %v2449_v61 }
 0x591   :  { %2465 = vmatprep.subr.bf16.mxu0 %v2691_v9 }
 0x592   :  { %v853_v4 = vld [vmem:[#allocation2 + $0x28] sm:$0xff] }
 0x593   :  { %2244 = vmatmul.mubr.msk.f32.vlgmr.msra.gmra.mrb[10].mxu0 %vm239_vm3, %v849_v0 }
 0x594   :  { %2246 = vmatprep.mubr.msk.f32.mxu0 %vm239_vm3, %v850_v1  ;;  %2467 = vmatpush3.bf16.msra.mxu0 %v2958_v7 }
 0x595   :  { %2468 = vmatprep.subr.bf16.mxu0 %v2691_v9 }
 0x597   :  { %2247 = vmatmul.mubr.msk.f32.gmra.mrb[12].mxu0 %vm239_vm3, %v851_v2 }
 0x598   :  { %2249 = vmatprep.mubr.msk.f32.mxu0 %vm239_vm3, %v852_v3  ;;  %2470 = vmatpush3.bf16.msra.mxu0 %v2962_v11 }
 0x599   :  { %2477 = vmatprep.subr.bf16.mxu0 %v2691_v9 }
 0x59b   :  { %2250 = vmatmul.mubr.msk.f32.gmra.mrb[14].mxu0 %vm239_vm3, %v853_v4 }
 0x65e   :  { %v765_v13 = vpop.f32.mrb[8].mxu0 }
 0x65f   :  { %v769_v14 = vadd.f32 %v765_v13, %v227_v12  ;;  %v2223_v16 = vpop.f32.mrb[9].mxu0  ;;  %v2501_v12 = vpack.c.bf16 %v1646_v10, %v1645_v8  ;;  %v1630_v13 = vld [vmem:[%s3264_s7 + $0x8] sm:$0xff] }
 0x660   :  { %v1648_v16 = vld [vmem:[%s3264_s7 + $0x98] sm:$0xff]  ;;  %v1744_v8 = vld [vmem:[%s3266_s9 + $0x28] sm:$0xff] }
 0x661   :  { %2594 = vtanh.f32 %v769_v14  ;;  %v1647_v14 = vld [vmem:[%s3264_s7 + $0x90] sm:$0xff] }
 0x666   :  { %v2245_v17 = vpop.f32.mrb[10].mxu0 }
 0x667   :  { %v957_v18 = vpop.f32.mrb[11].mxu0  ;;  %v963_v20 = vadd.f32 %v2245_v17, %v2995_v31 }
 0x668   :  { %v958_v32 = vadd.f32 %v2995_v31, %v957_v18  ;;  %v2505_v18 = vpack.c.bf16 %v1648_v16, %v1647_v14  ;;  %v1747_v14 = vld [vmem:[%s3266_s9 + $0x40] sm:$0xff]  ;;  %v1748_v16 = vld [vmem:[%s3266_s9 + $0x48] sm:$0xff] }
 0x66a   :  { %v2968_v21 = vpop.f32.mrb[12].mxu0 }
 0x66b   :  { %v2595_v23 = vpop.eup %2594  ;;  %v967_v24 = vpop.f32.mrb[13].mxu0  ;;  %v973_v51 = vadd.f32 %v2968_v21, %v2995_v31  ;;  %v1631_v21 = vld [vmem:[%s3264_s7 + $0x10] sm:$0xff] }
 0x66c   :  { %771 = vst.msk [vmem:[#allocation2 + $0x30] sm:$0xff] %vm239_vm3, %v2595_v23  ;;  %2233 = vmatmul.mubr.msk.f32.vlgmr.msra.gmra.mrb[12].mxu1 %vm239_vm3, %v2595_v23  ;;  %v968_v45 = vadd.f32 %v2995_v31, %v967_v24  ;;  %v1632_v23 = vld [vmem:[%s3264_s7 + $0x18] sm:$0xff]  ;;  %v1649_v24 = vld [vmem:[%s3264_s7 + $0xa0] sm:$0xff] }
 0x66d   :  { %2455 = vmatpush3.bf16.msra.mxu1 %v2958_v7  ;;  %2263 = vmatprep.mubr.msk.f32.mxu1 %vm2692_vm2, %v2693_v15 }
 0x66e   :  { %v2975_v22 = vpop.f32.mrb[14].mxu0  ;;  %2456 = vmatprep.subr.bf16.mxu1 %v2691_v9 }
 0x66f   :  { %v2978_v25 = vpop.f32.mrb[15].mxu0  ;;  %v983_v61 = vadd.f32 %v2975_v22, %v2995_v31  ;;  %v1650_v22 = vld [vmem:[%s3264_s7 + $0xa8] sm:$0xff] }
 0x670   :  { %v978_v56 = vadd.f32 %v2995_v31, %v2978_v25  ;;  %v2507_v25 = vpack.c.bf16 %v1632_v23, %v1631_v21  ;;  %v1750_v21 = vld [vmem:[%s3266_s9 + $0x58] sm:$0xff] }
 0x671   :  { %2458 = vmatpush3.bf16.msra.mxu1 %v2962_v11 }
 0x672   :  { %2459 = vmatprep.subr.bf16.mxu1 %v2691_v9 }
 0x673   :  { %v854_v26 = vld [vmem:[#allocation2 + $0x30] sm:$0xff] }
 0x674   :  { %2264 = vmatmul.mubr.f32.vlgmr.msra.gmra.mrb[14].mxu1 %v2693_v15  ;;  %2252 = vmatprep.mubr.msk.f32.mxu0 %vm239_vm3, %v854_v26  ;;  %v2509_v26 = vpack.c.bf16 %v1650_v22, %v1649_v24 }
 0x675   :  { %2461 = vmatpush3.bf16.msra.mxu1 %v2958_v7  ;;  %2274 = vmatprep.mubr.msk.f32.mxu1 %vm2692_vm2, %v2693_v15 }
 0x676   :  { %2462 = vmatprep.subr.bf16.mxu1 %v2691_v9 }
 0x679   :  { %2464 = vmatpush3.bf16.msra.mxu1 %v2962_v11 }
 0x67a   :  { %2471 = vmatprep.subr.bf16.mxu1 %v2691_v9 }
 0x73f   :  { %v841_v28 = vpop.f32.mrb[12].mxu1 }
 0x740   :  { %v845_v29 = vadd.f32 %v841_v28, %v232_v27  ;;  %v2234_v30 = vpop.f32.mrb[13].mxu1  ;;  %v1633_v27 = vld [vmem:[%s3264_s7 + $0x20] sm:$0xff]  ;;  %v1634_v28 = vld [vmem:[%s3264_s7 + $0x28] sm:$0xff] }
 0x741   :  { %v1652_v30 = vld [vmem:[%s3264_s7 + $0xb8] sm:$0xff] }
 0x742   :  { %2596 = vtanh.f32 %v845_v29  ;;  %v1651_v29 = vld [vmem:[%s3264_s7 + $0xb0] sm:$0xff] }
 0x747   :  { %v1066_v33 = vpop.f32.mrb[14].mxu1 }
 0x748   :  { %v1070_v34 = vadd.f32 %v1066_v33, %v958_v32  ;;  %v2265_v35 = vpop.f32.mrb[15].mxu1  ;;  %v2511_v32 = vpack.c.bf16 %v1634_v28, %v1633_v27  ;;  %v2513_v33 = vpack.c.bf16 %v1652_v30, %v1651_v29  ;;  %v1752_v27 = vld [vmem:[%s3266_s9 + $0x68] sm:$0xff]  ;;  %v1753_v29 = vld [vmem:[%s3266_s9 + $0x70] sm:$0xff] }
 0x749   :  { %v1636_v35 = vld [vmem:[%s3264_s7 + $0x38] sm:$0xff] }
 0x74a   :  { %2598 = vtanh.f32 %v1070_v34  ;;  %v1635_v34 = vld [vmem:[%s3264_s7 + $0x30] sm:$0xff] }
 0x74c   :  { %v2597_v36 = vpop.eup %2596 }
 0x74d   :  { %847 = vst.msk [vmem:[#allocation2 + $0x38] sm:$0xff] %vm239_vm3, %v2597_v36  ;;  %v1653_v36 = vld [vmem:[%s3264_s7 + $0xc0] sm:$0xff] }
 0x754   :  { %v2599_v37 = vpop.eup %2598  ;;  %v855_v19 = vld [vmem:[#allocation2 + $0x38] sm:$0xff] }
 0x755   :  { %1072 = vst.msk [vmem:[#allocation3] sm:$0xff] %vm239_vm3, %v2599_v37  ;;  %2275 = vmatmul.mubr.msk.f32.vlgmr.msra.gmra.mrb[16].mxu1 %vm239_vm3, %v2599_v37  ;;  %2253 = vmatmul.mubr.msk.f32.gmra.mrb[16].mxu0 %vm239_vm3, %v855_v19  ;;  %v1654_v37 = vld [vmem:[%s3264_s7 + $0xc8] sm:$0xff]  ;;  %v2515_v19 = vpack.c.bf16 %v1636_v35, %v1635_v34  ;;  %v1835_v34 = vld [vmem:[%s3268_s11 + $0x10] sm:$0xff] }
 0x756   :  { %2285 = vmatprep.mubr.msk.f32.mxu0 %vm2692_vm2, %v2693_v15  ;;  %2473 = vmatpush3.bf16.msra.mxu1 %v2958_v7 }
 0x757   :  { %2474 = vmatprep.subr.bf16.mxu1 %v2691_v9  ;;  %2296 = vmatprep.mubr.msk.f32.mxu1 %vm2692_vm2, %v2693_v15 }
 0x75a   :  { %2476 = vmatpush3.bf16.msra.mxu1 %v2962_v11 }
 0x75b   :  { %2483 = vmatprep.subr.bf16.mxu1 %v2691_v9 }
 0x828   :  { %v1142_v38 = vpop.f32.mrb[16].mxu1  ;;  %v3011_v39 = vpop.f32.mrb[16].mxu0 }
 0x829   :  { %v1146_v40 = vadd.f32 %v1142_v38, %v963_v20  ;;  %v2276_v41 = vpop.f32.mrb[17].mxu1  ;;  %v3013_v42 = vpop.f32.mrb[17].mxu0  ;;  %v2517_v20 = vpack.c.bf16 %v1654_v37, %v1653_v36  ;;  %v1637_v38 = vld [vmem:[%s3264_s7 + $0x40] sm:$0xff]  ;;  %v1836_v36 = vld [vmem:[%s3268_s11 + $0x18] sm:$0xff] }
 0x82a   :  { %v988_v3 = vadd.f32 %v2995_v31, %v3013_v42  ;;  %v1655_v41 = vld [vmem:[%s3264_s7 + $0xd0] sm:$0xff]  ;;  %v1656_v42 = vld [vmem:[%s3264_s7 + $0xd8] sm:$0xff]  ;;  %v2561_v37 = vpack.c.bf16 %v1836_v36, %v1835_v34 }
 0x82b   :  { %2600 = vtanh.f32 %v1146_v40  ;;  %v1638_v40 = vld [vmem:[%s3264_s7 + $0x48] sm:$0xff] }
 0x835   :  { %v2601_v43 = vpop.eup %2600 }
 0x836   :  { %1149 = vrot.lane.b32.xlu0 %v2601_v43, %s2694_s6  ;;  %2286 = vmatmul.mubr.msk.f32.vlgmr.msra.gmra.mrb[18].mxu0 %vm239_vm3, %v2601_v43  ;;  %v2519_v43 = vpack.c.bf16 %v1638_v40, %v1637_v38 }
 0x837   :  { %2479 = vmatpush3.bf16.msra.mxu0 %v2958_v7  ;;  %2307 = vmatprep.mubr.msk.f32.mxu0 %vm2692_vm2, %v2693_v15 }
 0x838   :  { %2480 = vmatprep.subr.bf16.mxu0 %v2691_v9 }
 0x83b   :  { %2482 = vmatpush3.bf16.msra.mxu0 %v2962_v11 }
 0x83c   :  { %2489 = vmatprep.subr.bf16.mxu0 %v2691_v9 }
 0x8a8   :  { %v1150_v44 = vpop.permute.xlu0 %1149 }
 0x8a9   :  { %1153 = vst.msk [vmem:[#allocation3] sm:$0xff] %vm1152_vm4, %v1150_v44 }
 0x909   :  { %v1222_v46 = vpop.f32.mrb[18].mxu0 }
 0x90a   :  { %v1226_v47 = vadd.f32 %v1222_v46, %v968_v45  ;;  %v2287_v48 = vpop.f32.mrb[19].mxu0  ;;  %v2521_v45 = vpack.c.bf16 %v1656_v42, %v1655_v41  ;;  %v1639_v46 = vld [vmem:[%s3264_s7 + $0x50] sm:$0xff] }
 0x90b   :  { %v1967_v41 = vld [vmem:[#allocation9] ss:$0 sm:$0xff] }
 0x90c   :  { %2602 = vtanh.f32 %v1226_v47  ;;  %v1640_v47 = vld [vmem:[%s3264_s7 + $0x58] sm:$0xff] }
 0x90d   :  { %v2523_v48 = vpack.c.bf16 %v1640_v47, %v1639_v46  ;;  %v1839_v46 = vld [vmem:[%s3268_s11 + $0x30] sm:$0xff]  ;;  %v1840_v47 = vld [vmem:[%s3268_s11 + $0x38] sm:$0xff] }
 0x916   :  { %v2603_v49 = vpop.eup %2602 }
 0x917   :  { %1229 = vrot.lane.b32.xlu1 %v2603_v49, %s2695_s5  ;;  %2297 = vmatmul.mubr.msk.f32.vlgmr.msra.gmra.mrb[18].mxu1 %vm239_vm3, %v2603_v49 }
 0x918   :  { %2485 = vmatpush3.bf16.msra.mxu1 %v2958_v7  ;;  %2318 = vmatprep.mubr.msk.f32.mxu1 %vm2692_vm2, %v2693_v15 }
 0x919   :  { %2486 = vmatprep.subr.bf16.mxu1 %v2691_v9 }
 0x91c   :  { %2488 = vmatpush3.bf16.msra.mxu1 %v2962_v11 }
 0x91d   :  { %2495 = vmatprep.subr.bf16.mxu1 %v2691_v9 }
 0x989   :  { %v1230_v50 = vpop.permute.xlu1 %1229 }
 0x98a   :  { %1233 = vst.msk [vmem:[#allocation3] sm:$0xff] %vm1232_vm5, %v1230_v50  ;;  %v993_v50 = vadd.f32 %v3011_v39, %v2995_v31 }
 0x9ea   :  { %v1302_v52 = vpop.f32.mrb[18].mxu1 }
 0x9eb   :  { %v1306_v53 = vadd.f32 %v1302_v52, %v973_v51  ;;  %v2298_v54 = vpop.f32.mrb[19].mxu1  ;;  %v1657_v51 = vld [vmem:[%s3264_s7 + $0xe0] sm:$0xff]  ;;  %v1658_v52 = vld [vmem:[%s3264_s7 + $0xe8] sm:$0xff] }
 0x9ec   :  { %v2525_v54 = vpack.c.bf16 %v1658_v52, %v1657_v51 }
 0x9ed   :  { %2604 = vtanh.f32 %v1306_v53 }
 0x9f7   :  { %v2605_v55 = vpop.eup %2604 }
 0x9f8   :  { %2308 = vmatmul.mubr.msk.f32.vlgmr.msra.gmra.mrb[20].mxu0 %vm239_vm3, %v2605_v55 }
 0x9f9   :  { %2491 = vmatpush3.bf16.msra.mxu0 %v2958_v7  ;;  %2329 = vmatprep.mubr.msk.f32.mxu0 %vm2692_vm2, %v2693_v15 }
 0x9fa   :  { %2492 = vmatprep.subr.bf16.mxu0 %v2691_v9 }
 0x9fd   :  { %2494 = vmatpush3.bf16.msra.mxu0 %v2962_v11 }
 0x9fe   :  { %2502 = vmatprep.subr.bf16.mxu0 %v2501_v12  ;;  %v1746_v12 = vld [vmem:[%s3266_s9 + $0x38] sm:$0xff] }
 0xacb   :  { %v1382_v57 = vpop.f32.mrb[20].mxu0 }
 0xacc   :  { %v1386_v58 = vadd.f32 %v1382_v57, %v978_v56  ;;  %v2309_v59 = vpop.f32.mrb[21].mxu0  ;;  %v1642_v56 = vld [vmem:[%s3264_s7 + $0x68] sm:$0xff] }
 0xacd   :  { %v1660_v59 = vld [vmem:[%s3264_s7 + $0xf8] sm:$0xff] }
 0xace   :  { %2606 = vtanh.f32 %v1386_v58  ;;  %v1659_v58 = vld [vmem:[%s3264_s7 + $0xf0] sm:$0xff] }
 0xad8   :  { %v2607_v60 = vpop.eup %2606 }
 0xad9   :  { %1388 = vst.msk [vmem:[#allocation3 + $0x8] sm:$0xff] %vm239_vm3, %v2607_v60  ;;  %2319 = vmatmul.mubr.msk.f32.vlgmr.msra.gmra.mrb[20].mxu1 %vm239_vm3, %v2607_v60  ;;  %v1643_v60 = vld [vmem:[%s3264_s7 + $0x70] sm:$0xff] }
 0xada   :  { %2497 = vmatpush3.bf16.msra.mxu1 %v2958_v7  ;;  %2340 = vmatprep.mubr.msk.f32.mxu1 %vm2692_vm2, %v2693_v15 }
 0xadb   :  { %2498 = vmatprep.subr.bf16.mxu1 %v2691_v9 }
 0xade   :  { %2500 = vmatpush3.bf16.msra.mxu1 %v2962_v11  ;;  %v1629_v11 = vld [vmem:[%s3264_s7] sm:$0xff] }
 0xadf   :  { %2533 = vmatprep.subr.bf16.mxu1 %v2691_v9  ;;  %v2503_v17 = vpack.c.bf16 %v1630_v13, %v1629_v11  ;;  %v1745_v11 = vld [vmem:[%s3266_s9 + $0x30] sm:$0xff] }
 0xae0   :  { %v2543_v13 = vpack.c.bf16 %v1746_v12, %v1745_v11 }
 0xbac   :  { %v1458_v62 = vpop.f32.mrb[20].mxu1 }
 0xbad   :  { %v1462_v63 = vadd.f32 %v1458_v62, %v983_v61  ;;  %v2320_v0 = vpop.f32.mrb[21].mxu1  ;;  %v2529_v61 = vpack.c.bf16 %v1660_v59, %v1659_v58  ;;  %v1644_v62 = vld [vmem:[%s3264_s7 + $0x78] sm:$0xff] }
 0xbae   :  { %v1739_v0 = vld [vmem:[%s3266_s9] sm:$0xff] }
 0xbaf   :  { %2608 = vtanh.f32 %v1462_v63  ;;  %v2531_v63 = vpack.c.bf16 %v1644_v62, %v1643_v60 }
 0xbb9   :  { %v2609_v1 = vpop.eup %2608 }
 0xbba   :  { %1465 = vrot.lane.b32.xlu0 %v2609_v1, %s2694_s6  ;;  %2330 = vmatmul.mubr.msk.f32.vlgmr.msra.gmra.mrb[22].mxu0 %vm239_vm3, %v2609_v1  ;;  %v1740_v1 = vld [vmem:[%s3266_s9 + $0x8] sm:$0xff] }
 0xbbb   :  { %2504 = vmatpush3.bf16.msra.mxu0 %v2503_v17  ;;  %v2546_v17 = vpack.c.bf16 %v1748_v16, %v1747_v14 }
 0xbbc   :  { %2506 = vmatprep.subr.bf16.mxu0 %v2505_v18  ;;  %v1749_v18 = vld [vmem:[%s3266_s9 + $0x50] sm:$0xff] }
 0xbbd   :  { %v2549_v23 = vpack.c.bf16 %v1750_v21, %v1749_v18 }
 0xbbf   :  { %2508 = vmatpush3.bf16.msra.mxu0 %v2507_v25 }
 0xbc0   :  { %2510 = vmatprep.subr.bf16.mxu0 %v2509_v26  ;;  %v1751_v26 = vld [vmem:[%s3266_s9 + $0x60] sm:$0xff] }
 0xbc1   :  { %v2552_v28 = vpack.c.bf16 %v1752_v27, %v1751_v26 }
 0xbc3   :  { %2512 = vmatpush3.bf16.msra.mxu0 %v2511_v32  ;;  %v1833_v32 = vld [vmem:[%s3268_s11] sm:$0xff] }
 0xbc4   :  { %2514 = vmatprep.subr.bf16.mxu0 %v2513_v33  ;;  %v1834_v33 = vld [vmem:[%s3268_s11 + $0x8] sm:$0xff] }
 0xbc5   :  { %v2558_v35 = vpack.c.bf16 %v1834_v33, %v1833_v32 }
 0xbc7   :  { %2516 = vmatpush3.bf16.msra.mxu0 %v2515_v19  ;;  %v1837_v19 = vld [vmem:[%s3268_s11 + $0x20] sm:$0xff] }
 0xbc8   :  { %2518 = vmatprep.subr.bf16.mxu0 %v2517_v20  ;;  %v1838_v20 = vld [vmem:[%s3268_s11 + $0x28] sm:$0xff] }
 0xbc9   :  { %v2564_v38 = vpack.c.bf16 %v1838_v20, %v1837_v19 }
 0xbcb   :  { %2520 = vmatpush3.bf16.msra.mxu0 %v2519_v43 }
 0xbcc   :  { %2522 = vmatprep.subr.bf16.mxu0 %v2521_v45 }
 0xbcf   :  { %2524 = vmatpush3.bf16.msra.mxu0 %v2523_v48  ;;  %v2567_v48 = vpack.c.bf16 %v1840_v47, %v1839_v46 }
 0xbd0   :  { %2526 = vmatprep.subr.bf16.mxu0 %v2525_v54 }
 0xc2c   :  { %v1466_v2 = vpop.permute.xlu0 %1465 }
 0xc2d   :  { %1468 = vst.msk [vmem:[#allocation3 + $0x8] sm:$0xff] %vm1152_vm4, %v1466_v2  ;;  %v1741_v2 = vld [vmem:[%s3266_s9 + $0x10] sm:$0xff] }
 0xc8d   :  { %v1537_v4 = vpop.f32.mrb[22].mxu0 }
 0xc8e   :  { %v1541_v5 = vadd.f32 %v1537_v4, %v988_v3  ;;  %v2331_v6 = vpop.f32.mrb[23].mxu0  ;;  %v2534_v3 = vpack.c.bf16 %v1740_v1, %v1739_v0  ;;  %v1742_v4 = vld [vmem:[%s3266_s9 + $0x18] sm:$0xff] }
 0xc8f   :  { %v2537_v6 = vpack.c.bf16 %v1742_v4, %v1741_v2 }
 0xc90   :  { %2610 = vtanh.f32 %v1541_v5 }
 0xc9a   :  { %v2611_v7 = vpop.eup %2610 }
 0xc9b   :  { %1544 = vrot.lane.b32.xlu1 %v2611_v7, %s2695_s5  ;;  %2341 = vmatmul.mubr.msk.f32.vlgmr.msra.gmra.mrb[22].mxu1 %vm239_vm3, %v2611_v7  ;;  %v1743_v7 = vld [vmem:[%s3266_s9 + $0x20] sm:$0xff] }
 0xc9c   :  { %2375 = vmatprep.mubr.msk.f32.mxu1 %vm2692_vm2, %v2693_v15  ;;  %2535 = vmatpush3.bf16.msra.mxu1 %v2534_v3  ;;  %v2540_v10 = vpack.c.bf16 %v1744_v8, %v1743_v7 }
 0xc9d   :  { %2536 = vmatprep.subr.bf16.mxu1 %v2691_v9 }
 0xc9f   :  { %1309 = vrot.lane.b32.xlu1 %v2605_v55, %s2696_s8  ;;  %v1641_v55 = vld [vmem:[%s3264_s7 + $0x60] sm:$0xff] }
 0xca0   :  { %v2527_v39 = vpack.c.bf16 %v1642_v56, %v1641_v55  ;;  %2538 = vmatpush3.bf16.msra.mxu1 %v2537_v6 }
 0xca1   :  { %2539 = vmatprep.subr.bf16.mxu1 %v2691_v9 }
 0xca2   :  { %2528 = vmatpush3.bf16.msra.mxu0 %v2527_v39 }
 0xca3   :  { %2530 = vmatprep.subr.bf16.mxu0 %v2529_v61 }
 0xca4   :  { %2541 = vmatpush3.bf16.msra.mxu1 %v2540_v10 }
 0xca5   :  { %2542 = vmatprep.subr.bf16.mxu1 %v2691_v9 }
 0xca6   :  { %2532 = vmatpush3.bf16.msra.mxu0 %v2531_v63 }
 0xca7   :  { %2557 = vmatprep.subr.bf16.mxu0 %v2691_v9 }
 0xca8   :  { %2544 = vmatpush3.bf16.msra.mxu1 %v2543_v13 }
 0xca9   :  { %2545 = vmatprep.subr.bf16.mxu1 %v2691_v9 }
 0xcac   :  { %2547 = vmatpush3.bf16.msra.mxu1 %v2546_v17 }
 0xcad   :  { %2548 = vmatprep.subr.bf16.mxu1 %v2691_v9 }
 0xcb0   :  { %2550 = vmatpush3.bf16.msra.mxu1 %v2549_v23 }
 0xcb1   :  { %2551 = vmatprep.subr.bf16.mxu1 %v2691_v9 }
 0xcb4   :  { %2553 = vmatpush3.bf16.msra.mxu1 %v2552_v28 }
 0xcb5   :  { %2554 = vmatprep.subr.bf16.mxu1 %v2691_v9 }
 0xd0d   :  { %v1545_v44 = vpop.permute.xlu1 %1544 }
 0xd0e   :  { %1547 = vst.msk [vmem:[#allocation3 + $0x8] sm:$0xff] %vm1232_vm5, %v1545_v44 }
 0xd11   :  { %v1310_v49 = vpop.permute.xlu1 %1309 }
 0xd12   :  { %1313 = vst.msk [vmem:[#allocation3] sm:$0xff] %vm1312_vm6, %v1310_v49 }
 0xd19   :  { %v1627_v25 = vld [vmem:[#allocation3] sm:$0xff] }
 0xd6e   :  { %v1616_v53 = vpop.f32.mrb[22].mxu1 }
 0xd6f   :  { %v1620_v57 = vadd.f32 %v1616_v53, %v993_v50  ;;  %v2342_v31 = vpop.f32.mrb[23].mxu1  ;;  %v1969_v53 = vld [vmem:[#allocation4] ss:$0 sm:$0xff] }
 0xd71   :  { %2612 = vtanh.f32 %v1620_v57 }
 0xd7b   :  { %v2613_v5 = vpop.eup %2612 }
 0xd7c   :  { %1623 = vrot.lane.b32.xlu0 %v2613_v5, %s2696_s8 }
 0xdee   :  { %v1624_v24 = vpop.permute.xlu0 %1623 }
 0xdef   :  { %1626 = vst.msk [vmem:[#allocation3 + $0x8] sm:$0xff] %vm1312_vm6, %v1624_v24 }
 0xdf6   :  { %v1628_v22 = vld [vmem:[#allocation3 + $0x8] sm:$0xff] }
 0xdf7   :  { %1732 = vmatprep.mubr.f32.mxu0 %v1628_v22 }
 0xdf8   :  { %1733 = vmatmul.mubr.f32.vlgmr.msra.gmra.mrb[24].mxu0 %v1627_v25 }
 0xdf9   :  { %2394 = vmatprep.mubr.msk.f32.mxu0 %vm2692_vm2, %v2693_v15  ;;  %v1754_v15 = vld [vmem:[%s3266_s9 + $0x78] sm:$0xff]  ;;  %2559 = vmatpush3.bf16.msra.mxu0 %v2558_v35 }
 0xdfa   :  { %v2555_v30 = vpack.c.bf16 %v1754_v15, %v1753_v29  ;;  %2560 = vmatprep.subr.bf16.mxu0 %v2691_v9 }
 0xdfc   :  { %2556 = vmatpush3.bf16.msra.mxu1 %v2555_v30 }
 0xdfd   :  { %2562 = vmatpush3.bf16.msra.mxu0 %v2561_v37 }
 0xdfe   :  { %2563 = vmatprep.subr.bf16.mxu0 %v2691_v9 }
 0xe01   :  { %2565 = vmatpush3.bf16.msra.mxu0 %v2564_v38 }
 0xe02   :  { %2566 = vmatprep.subr.bf16.mxu0 %v2691_v9  ;;  %v1968_v9 = vld [vmem:[%s3267_s10] ss:$0 sm:$0xff] }
 0xe05   :  { %2568 = vmatpush3.bf16.msra.mxu0 %v2567_v48 }
 0xecb   :  { %v2104_v40 = vpop.f32.mrb[24].mxu0 }
 0xecc   :  { %v2105_v42 = vpop.f32.mrb[25].mxu0 }
 0xecd   :  { %v2106_v43 = vadd.f32 %v2105_v42, %v2104_v40 }
 0xecf   :  { %v1735_v44 = vadd.f32 %v2106_v43, %v1967_v41 }
 0xed1   :  { %v1738_v45 = vmax.f32 %v1735_v44, 0.0 }
 0xed3   :  { %2376 = vmatmul.mubr.f32.vlgmr.msra.gmra.mrb[24].mxu1 %v1738_v45 }
 0xfa6   :  { %v1828_v49 = vpop.f32.mrb[24].mxu1 }
 0xfa7   :  { %v1829_v50 = vadd.f32 %v1968_v9, %v1828_v49  ;;  %v2377_v51 = vpop.f32.mrb[25].mxu1 }
 0xfa9   :  { %v1832_v52 = vmax.f32 %v1829_v50, 0.0 }
 0xfab   :  { %2395 = vmatmul.mubr.msk.f32.vlgmr.msra.gmra.mrb[26].mxu0 %vm1848_vm7, %v1832_v52 }
0x107e   :  { %v1918_v54 = vpop.f32.mrb[26].mxu0 }
0x107f   :  { %v1919_v55 = vadd.f32 %v1969_v53, %v1918_v54  ;;  %v2396_v56 = vpop.f32.mrb[27].mxu0 }
0x1081   :  { %v1922_v57 = vmul.f32 0.5, %v1919_v55 }
0x1083   :  { %2614 = vtanh.f32 %v1922_v57 }
0x108d   :  { %v2615_v31 = vpop.eup %2614 }
0x108e   :  { %v1924_v39 = vadd.f32 1.0, %v2615_v31 }
0x1090   :  { %v1925_v58 = vmul.f32 0.5, %v1924_v39 }
0x1092   :  { %1927 = vst.msk [vmem:[%s3270_s13] sm:$0xff] %vm1926_vm8, %v1925_v58 }
0x1093   :  { %1932 = vsyncpa [#allocation6], 1 }
0x1094   :  { %1933 = vsyncpa [#allocation8], 1 }

</bundles_post_ra>
